<compile_context>
chip_gen: v6e
topology: v6e:2x2x1
jax: 0.10.0
libtpu: 0.0.40
codegen_flags: <defaults>
</compile_context>

<pallas_src>
import functools

import jax
import jax.numpy as jnp
from jax.experimental import pallas as pl
from jax.experimental.pallas import tpu as pltpu


def _round_up(x, m):
    return ((x + m - 1) // m) * m


def addnorm_ffn_kernel(x_ref, w1_ref, b1_ref, w2_ref, b2_ref,
                       gamma_ref, beta_ref, o_ref, acc_ref, *, eps):
    # grid = (row_tiles, f_tiles).  f (d_ff) is a streamed reduction axis
    # (a single step when the weights are fully VMEM-resident).
    # x_ref: (TM, D); w1_ref: (D, TF); b1_ref: (1, TF); w2_ref: (TF, D);
    # b2/gamma/beta: (1, D); o_ref: (TM, D); acc_ref: (TM, D) f32 scratch.
    f = pl.program_id(1)

    @pl.when(f == 0)
    def _():
        acc_ref[...] = jnp.zeros_like(acc_ref)

    # ---- Sublayer (FeedForward) partial over this d_ff slab, on the MXU ----
    x = x_ref[...]
    h = jnp.dot(x, w1_ref[...], preferred_element_type=jnp.float32)
    h = jnp.maximum(h + b1_ref[...].astype(jnp.float32), 0.0)
    acc_ref[...] += jnp.dot(h.astype(w2_ref.dtype), w2_ref[...],
                            preferred_element_type=jnp.float32)

    # ---- Last d_ff step: bias2, dropout (eval identity), residual, LayerNorm ----
    @pl.when(f == pl.num_programs(1) - 1)
    def _():
        # TODO(synk): training-mode dropout would use pltpu.prng_seed/prng_random_bits.
        sub = acc_ref[...] + b2_ref[...].astype(jnp.float32)
        y = x.astype(jnp.float32) + sub

        d = y.shape[-1]
        inv_d = 1.0 / d
        mean = jnp.sum(y, axis=-1, keepdims=True) * inv_d
        c = y - mean                                    # center before squaring:
        var = jnp.sum(c * c, axis=-1, keepdims=True) * inv_d  # avoids E[y^2]-E[y]^2 cancellation
        norm = c * jax.lax.rsqrt(var + eps)
        out = (norm * gamma_ref[...].astype(jnp.float32)
               + beta_ref[...].astype(jnp.float32))
        o_ref[...] = out.astype(o_ref.dtype)


def _vmem_target_bytes():
    """Per-generation usable VMEM budget: physical capacity minus headroom."""
    try:
        cap = int(pltpu.get_tpu_info().vmem_capacity_bytes)
    except Exception:
        cap = 64 << 20  # conservative fallback (v7x per-core VMEM)
    return max(cap - (16 << 20), 32 << 20)


def _choose_tiles(N, D, F, in_b, w_b, vmem_target):
    """Pick (tm, tf, pad_f).  Prefer fully VMEM-resident weights (tf == F);
    otherwise stream d_ff slabs with tm as large as the budget allows."""
    row_align = max(8, 32 // in_b)          # sublane packing for x dtype
    budget = vmem_target - (4 << 20)        # headroom for compiler internals
    small = 2 * (F + 3 * D) * w_b           # b1 / b2 / gamma / beta (double-buffered)

    def max_rows(tf, weight_bytes):
        # per-row resident bytes: 2x x tile + 2x out tile + f32 acc + f32 h row
        per_row = 4 * D * in_b + D * 4 + tf * 4
        avail = budget - weight_bytes - small
        return avail // per_row if avail > 0 else 0

    # Option A: weights fully resident -> DMA'd exactly once for the whole grid.
    rows_resident = max_rows(F, 4 * D * F * w_b)
    if rows_resident >= min(256, _round_up(N, row_align)):
        tf, pad_f, tm_cap = F, False, rows_resident
    else:
        # Option B: stream d_ff.  Pick the largest tf that divides F (avoids
        # per-call weight padding) while still allowing a large row tile.
        divisors = [t for t in range(128, min(F, 2048) + 1, 128) if F % t == 0]
        if divisors:
            want_rows = min(1024, _round_up(N, row_align))
            tf = divisors[0]
            for t in divisors:
                if max_rows(t, 4 * D * t * w_b) >= want_rows:
                    tf = t
            pad_f = False
        else:
            # Rare: F not a multiple of 128 -> fall back to padding the weights.
            tf, pad_f = min(_round_up(F, 128), 1024), True
        tm_cap = max(max_rows(tf, 4 * D * tf * w_b), row_align)

    tm = min(tm_cap, 1024, _round_up(N, row_align))
    tm = max(row_align, (tm // row_align) * row_align)
    # Megacore (v7x): keep the "parallel" row axis at >= 2 tiles when N allows.
    if pl.cdiv(N, tm) == 1 and N >= 2 * row_align:
        tm = _round_up(pl.cdiv(N, 2), row_align)
    return tm, tf, pad_f


def add_norm_wrapper(x, w1, b1, w2, b2, gamma, beta, *, eps=1e-5):
    """x: (B, S, D). Returns (B, S, D) = LayerNorm(x + FFN(x))."""
    B, S, D = x.shape
    Dw, F = w1.shape
    assert Dw == D and w2.shape == (F, D)
    # NOTE: for best store performance D should be a multiple of 128 (lane width).

    N = B * S
    x2 = x.reshape(N, D)

    in_b = jnp.dtype(x.dtype).itemsize
    w_b = jnp.dtype(w1.dtype).itemsize
    vmem_target = _vmem_target_bytes()
    tm, tf, pad_f = _choose_tiles(N, D, F, in_b, w_b, vmem_target)

    Fp = F
    if pad_f:
        # Fallback only (F not a multiple of 128): per-call weight padding.
        Fp = _round_up(F, tf)
        w1 = jnp.pad(w1, ((0, 0), (0, Fp - F)))
        b1 = jnp.pad(b1, ((0, 0), (0, Fp - F)))
        w2 = jnp.pad(w2, ((0, Fp - F), (0, 0)))

    # Ragged N: no padded copy of x -- Pallas masks the partial edge row block
    # (garbage rows only produce garbage in their own discarded output rows).
    grid = (pl.cdiv(N, tm), Fp // tf)

    # Explicit VMEM budget (double-buffered streams + scratch), with headroom.
    est = (4 * tm * D * in_b                  # x + out tiles (double-buffered)
           + 4 * D * tf * w_b                 # w1 / w2 slabs (double-buffered)
           + 2 * (tf + 3 * D) * w_b           # b1 / b2 / gamma / beta
           + tm * D * 4                       # f32 accumulator scratch
           + tm * tf * 4)                     # f32 h intermediate
    vmem_limit = int(min(vmem_target, max(int(est * 1.3) + (4 << 20), 32 << 20)))

    # Advisory cost hint so XLA can schedule surrounding ops around the kernel.
    weight_passes = grid[0] if tf < Fp else 1
    cost = pl.CostEstimate(
        flops=4 * N * D * F,
        transcendentals=N,
        bytes_accessed=int(2 * N * D * in_b
                           + (2 * D * Fp + Fp + 3 * D) * w_b * weight_passes))

    kernel = functools.partial(addnorm_ffn_kernel, eps=eps)

    out = pl.pallas_call(
        kernel,
        out_shape=jax.ShapeDtypeStruct((N, D), x.dtype),
        grid_spec=pltpu.PrefetchScalarGridSpec(
            num_scalar_prefetch=0,
            grid=grid,
            in_specs=[
                pl.BlockSpec((tm, D), lambda i, f: (i, 0)),   # x rows (revisited across f)
                pl.BlockSpec((D, tf), lambda i, f: (0, f)),   # w1 column slab
                pl.BlockSpec((1, tf), lambda i, f: (0, f)),   # b1 slab
                pl.BlockSpec((tf, D), lambda i, f: (f, 0)),   # w2 row slab
                pl.BlockSpec((1, D), lambda i, f: (0, 0)),    # b2 (constant, tiny)
                pl.BlockSpec((1, D), lambda i, f: (0, 0)),    # gamma
                pl.BlockSpec((1, D), lambda i, f: (0, 0)),    # beta
            ],
            out_specs=pl.BlockSpec((tm, D), lambda i, f: (i, 0)),
            scratch_shapes=[pltpu.VMEM((tm, D), jnp.float32)],
        ),
        compiler_params=pltpu.CompilerParams(
            dimension_semantics=("parallel", "arbitrary"),
            vmem_limit_bytes=vmem_limit,
        ),
        cost_estimate=cost,
    )(x2, w1, b1, w2, b2, gamma, beta)

    return out.reshape(B, S, D)


def reference(x, w1, b1, w2, b2, gamma, beta, eps=1e-5):
    h = jnp.maximum(jnp.dot(x, w1, preferred_element_type=jnp.float32) + b1, 0.0)
    sub = jnp.dot(h, w2, preferred_element_type=jnp.float32) + b2
    y = x + sub
    mean = jnp.mean(y, axis=-1, keepdims=True)
    var = jnp.mean((y - mean) ** 2, axis=-1, keepdims=True)
    return (y - mean) / jnp.sqrt(var + eps) * gamma + beta


if __name__ == "__main__":
    # Small but lane-aligned shapes (D, F multiples of 128).
    B, S, D, F = 2, 8, 128, 256

    key = jax.random.PRNGKey(0)
    kx, kw1, kb1, kw2, kb2 = jax.random.split(key, 5)

    x = jax.random.normal(kx, (B, S, D), dtype=jnp.float32)
    # Deterministic synthetic params (roughly PyTorch-default scaled).
    w1 = jax.random.normal(kw1, (D, F), dtype=jnp.float32) * (1.0 / jnp.sqrt(D))
    b1 = jax.random.normal(kb1, (1, F), dtype=jnp.float32) * 0.01
    w2 = jax.random.normal(kw2, (F, D), dtype=jnp.float32) * (1.0 / jnp.sqrt(F))
    b2 = jax.random.normal(kb2, (1, D), dtype=jnp.float32) * 0.01
    gamma = jnp.ones((1, D), dtype=jnp.float32)   # nn.LayerNorm weight init
    beta = jnp.zeros((1, D), dtype=jnp.float32)   # nn.LayerNorm bias init

    out = add_norm_wrapper(x, w1, b1, w2, b2, gamma, beta)
    out = jax.block_until_ready(out)

    ref = reference(x, w1, b1, w2, b2, gamma.reshape(D), beta.reshape(D))
    assert out.shape == (B, S, D)
    assert jnp.allclose(out, ref, atol=1e-3, rtol=1e-3), "mismatch vs reference"

    print("KERNEL_OK")
</pallas_src>

<mosaic_0001>
module attributes {stable_mosaic.version = 11 : i64} {
  func.func @addnorm_ffn_kernel(%arg0: i32, %arg1: i32, %arg2: memref<8x128xf32, #tpu.memory_space<vmem>>, %arg3: memref<128x256xf32, #tpu.memory_space<vmem>>, %arg4: memref<1x256xf32, #tpu.memory_space<vmem>>, %arg5: memref<256x128xf32, #tpu.memory_space<vmem>>, %arg6: memref<1x128xf32, #tpu.memory_space<vmem>>, %arg7: memref<1x128xf32, #tpu.memory_space<vmem>>, %arg8: memref<1x128xf32, #tpu.memory_space<vmem>>, %arg9: memref<8x128xf32, #tpu.memory_space<vmem>>, %arg10: memref<8x128xf32, #tpu.memory_space<vmem>>) attributes {dimension_semantics = [#tpu.dimension_semantics<parallel>, #tpu.dimension_semantics<arbitrary>], iteration_bounds = array<i64: 2, 1>, scalar_prefetch = 0 : i64, scratch_operands = 1 : i64, tpu.core_type = #tpu.core_type<tc>, window_params = [{transform_indices = @transform_0, window_bounds = array<i64: 8, 128>}, {transform_indices = @transform_1, window_bounds = array<i64: 128, 256>}, {transform_indices = @transform_2, window_bounds = array<i64: 1, 256>}, {transform_indices = @transform_3, window_bounds = array<i64: 256, 128>}, {pipeline_mode = #tpu.pipeline_mode<synchronous>, transform_indices = @transform_4, window_bounds = array<i64: 1, 128>}, {pipeline_mode = #tpu.pipeline_mode<synchronous>, transform_indices = @transform_5, window_bounds = array<i64: 1, 128>}, {pipeline_mode = #tpu.pipeline_mode<synchronous>, transform_indices = @transform_6, window_bounds = array<i64: 1, 128>}, {transform_indices = @transform_7, window_bounds = array<i64: 8, 128>}]} {
    %c0_i32 = arith.constant 0 : i32
    %0 = arith.cmpi eq, %arg1, %c0_i32 : i32
    %1 = arith.extui %0 : i1 to i32
    %c0_i32_0 = arith.constant 0 : i32
    %2 = arith.cmpi ne, %1, %c0_i32_0 : i32
    scf.if %2 {
      %cst_16 = arith.constant 0.000000e+00 : f32
      %19 = vector.broadcast %cst_16 : f32 to vector<8x128xf32>
      %c0_17 = arith.constant 0 : index
      %c0_18 = arith.constant 0 : index
      %20 = vector.load %arg10[%c0_17, %c0_18] : memref<8x128xf32, #tpu.memory_space<vmem>>, vector<8x128xf32>
      tpu.vector_store %arg10[%c0_17, %c0_18], %19 {strides = array<i32>} : memref<8x128xf32, #tpu.memory_space<vmem>>, vector<8x128xf32>,
    } else {
    }
    %c0 = arith.constant 0 : index
    %c0_1 = arith.constant 0 : index
    %3 = vector.load %arg2[%c0, %c0_1] : memref<8x128xf32, #tpu.memory_space<vmem>>, vector<8x128xf32>
    %c0_2 = arith.constant 0 : index
    %c0_3 = arith.constant 0 : index
    %4 = vector.load %arg3[%c0_2, %c0_3] : memref<128x256xf32, #tpu.memory_space<vmem>>, vector<128x256xf32>
    %cst = arith.constant dense<0.000000e+00> : vector<8x256xf32>
    %5 = tpu.matmul %3, %4, %cst {dimension_numbers = #tpu.dot_dimension_numbers<[1], [0], [0], [1], [0, 0, 1, 1], [], []>} : vector<8x128xf32>, vector<128x256xf32>, vector<8x256xf32> -> vector<8x256xf32>
    %c0_4 = arith.constant 0 : index
    %c0_5 = arith.constant 0 : index
    %6 = vector.load %arg4[%c0_4, %c0_5] : memref<1x256xf32, #tpu.memory_space<vmem>>, vector<1x256xf32>
    %7 = vector.broadcast %6 : vector<1x256xf32> to vector<8x256xf32>
    %8 = arith.addf %5, %7 : vector<8x256xf32>
    %cst_6 = arith.constant 0.000000e+00 : f32
    %9 = vector.broadcast %cst_6 : f32 to vector<8x256xf32>
    %10 = arith.maximumf %8, %9 : vector<8x256xf32>
    %c0_7 = arith.constant 0 : index
    %c0_8 = arith.constant 0 : index
    %11 = vector.load %arg10[%c0_7, %c0_8] : memref<8x128xf32, #tpu.memory_space<vmem>>, vector<8x128xf32>
    %c0_9 = arith.constant 0 : index
    %c0_10 = arith.constant 0 : index
    %12 = vector.load %arg5[%c0_9, %c0_10] : memref<256x128xf32, #tpu.memory_space<vmem>>, vector<256x128xf32>
    %cst_11 = arith.constant dense<0.000000e+00> : vector<8x128xf32>
    %13 = tpu.matmul %10, %12, %cst_11 {dimension_numbers = #tpu.dot_dimension_numbers<[1], [0], [0], [1], [0, 0, 1, 1], [], []>} : vector<8x256xf32>, vector<256x128xf32>, vector<8x128xf32> -> vector<8x128xf32>
    %14 = arith.addf %11, %13 : vector<8x128xf32>
    %c0_12 = arith.constant 0 : index
    %c0_13 = arith.constant 0 : index
    %15 = vector.load %arg10[%c0_12, %c0_13] : memref<8x128xf32, #tpu.memory_space<vmem>>, vector<8x128xf32>
    tpu.vector_store %arg10[%c0_12, %c0_13], %14 {strides = array<i32>} : memref<8x128xf32, #tpu.memory_space<vmem>>, vector<8x128xf32>,
    %c0_i32_14 = arith.constant 0 : i32
    %16 = arith.cmpi eq, %arg1, %c0_i32_14 : i32
    %17 = arith.extui %16 : i1 to i32
    %c0_i32_15 = arith.constant 0 : i32
    %18 = arith.cmpi ne, %17, %c0_i32_15 : i32
    scf.if %18 {
      %c0_16 = arith.constant 0 : index
      %c0_17 = arith.constant 0 : index
      %19 = vector.load %arg10[%c0_16, %c0_17] : memref<8x128xf32, #tpu.memory_space<vmem>>, vector<8x128xf32>
      %c0_18 = arith.constant 0 : index
      %c0_19 = arith.constant 0 : index
      %20 = vector.load %arg6[%c0_18, %c0_19] : memref<1x128xf32, #tpu.memory_space<vmem>>, vector<1x128xf32>
      %21 = vector.broadcast %20 : vector<1x128xf32> to vector<8x128xf32>
      %22 = arith.addf %19, %21 : vector<8x128xf32>
      %23 = arith.addf %3, %22 : vector<8x128xf32>
      %cst_20 = arith.constant dense<0.000000e+00> : vector<8xf32>
      %24 = vector.multi_reduction <add>, %23, %cst_20 [1] : vector<8x128xf32> to vector<8xf32>
      %25 = vector.shape_cast %24 : vector<8xf32> to vector<8x1xf32>
      %cst_21 = arith.constant 7.812500e-03 : f32
      %26 = vector.broadcast %cst_21 : f32 to vector<8x1xf32>
      %27 = arith.mulf %25, %26 : vector<8x1xf32>
      %28 = vector.broadcast %27 : vector<8x1xf32> to vector<8x128xf32>
      %29 = arith.subf %23, %28 : vector<8x128xf32>
      %30 = arith.mulf %29, %29 : vector<8x128xf32>
      %cst_22 = arith.constant dense<0.000000e+00> : vector<8xf32>
      %31 = vector.multi_reduction <add>, %30, %cst_22 [1] : vector<8x128xf32> to vector<8xf32>
      %32 = vector.shape_cast %31 : vector<8xf32> to vector<8x1xf32>
      %cst_23 = arith.constant 7.812500e-03 : f32
      %33 = vector.broadcast %cst_23 : f32 to vector<8x1xf32>
      %34 = arith.mulf %32, %33 : vector<8x1xf32>
      %cst_24 = arith.constant 9.99999974E-6 : f32
      %35 = vector.broadcast %cst_24 : f32 to vector<8x1xf32>
      %36 = arith.addf %34, %35 : vector<8x1xf32>
      %37 = math.rsqrt %36 : vector<8x1xf32>
      %38 = vector.broadcast %37 : vector<8x1xf32> to vector<8x128xf32>
      %39 = arith.mulf %29, %38 : vector<8x128xf32>
      %c0_25 = arith.constant 0 : index
      %c0_26 = arith.constant 0 : index
      %40 = vector.load %arg7[%c0_25, %c0_26] : memref<1x128xf32, #tpu.memory_space<vmem>>, vector<1x128xf32>
      %41 = vector.broadcast %40 : vector<1x128xf32> to vector<8x128xf32>
      %42 = arith.mulf %39, %41 : vector<8x128xf32>
      %c0_27 = arith.constant 0 : index
      %c0_28 = arith.constant 0 : index
      %43 = vector.load %arg8[%c0_27, %c0_28] : memref<1x128xf32, #tpu.memory_space<vmem>>, vector<1x128xf32>
      %44 = vector.broadcast %43 : vector<1x128xf32> to vector<8x128xf32>
      %45 = arith.addf %42, %44 : vector<8x128xf32>
      %c0_29 = arith.constant 0 : index
      %c0_30 = arith.constant 0 : index
      %46 = vector.load %arg9[%c0_29, %c0_30] : memref<8x128xf32, #tpu.memory_space<vmem>>, vector<8x128xf32>
      tpu.vector_store %arg9[%c0_29, %c0_30], %45 {strides = array<i32>} : memref<8x128xf32, #tpu.memory_space<vmem>>, vector<8x128xf32>,
    } else {
    }
    return
  }
  func.func @transform_0(%arg0: i32, %arg1: i32) -> (i32, i32) {
    %c0_i32 = arith.constant 0 : i32
    %c0_i32_0 = arith.constant 0 : i32
    return %arg0, %c0_i32 : i32, i32
  }
  func.func @transform_1(%arg0: i32, %arg1: i32) -> (i32, i32) {
    %c0_i32 = arith.constant 0 : i32
    %c0_i32_0 = arith.constant 0 : i32
    return %c0_i32, %arg1 : i32, i32
  }
  func.func @transform_2(%arg0: i32, %arg1: i32) -> (i32, i32) {
    %c0_i32 = arith.constant 0 : i32
    %c0_i32_0 = arith.constant 0 : i32
    return %c0_i32, %arg1 : i32, i32
  }
  func.func @transform_3(%arg0: i32, %arg1: i32) -> (i32, i32) {
    %c0_i32 = arith.constant 0 : i32
    %c0_i32_0 = arith.constant 0 : i32
    return %arg1, %c0_i32 : i32, i32
  }
  func.func @transform_4(%arg0: i32, %arg1: i32) -> (i32, i32) {
    %c0_i32 = arith.constant 0 : i32
    %c0_i32_0 = arith.constant 0 : i32
    %c0_i32_1 = arith.constant 0 : i32
    return %c0_i32, %c0_i32_0 : i32, i32
  }
  func.func @transform_5(%arg0: i32, %arg1: i32) -> (i32, i32) {
    %c0_i32 = arith.constant 0 : i32
    %c0_i32_0 = arith.constant 0 : i32
    %c0_i32_1 = arith.constant 0 : i32
    return %c0_i32, %c0_i32_0 : i32, i32
  }
  func.func @transform_6(%arg0: i32, %arg1: i32) -> (i32, i32) {
    %c0_i32 = arith.constant 0 : i32
    %c0_i32_0 = arith.constant 0 : i32
    %c0_i32_1 = arith.constant 0 : i32
    return %c0_i32, %c0_i32_0 : i32, i32
  }
  func.func @transform_7(%arg0: i32, %arg1: i32) -> (i32, i32) {
    %c0_i32 = arith.constant 0 : i32
    %c0_i32_0 = arith.constant 0 : i32
    return %arg0, %c0_i32 : i32, i32
  }
}

</mosaic_0001>

<bundles_post_ra>
// kernel: tpu_custom_call.1
= control target key start
LH: loop header
LB: loop body
LE: loop exit
PB: predicated region body
PF: predicated region fallthrough
CT: control target
= control target key end

     0   :  { %s1322_s0 = inlined_call_operand.hbm [shape: f32[16,128], index: 0, kind: input, shape index: {}]   ;;  %s1323_s1 = inlined_call_operand.hbm [shape: f32[128,256], index: 1, kind: input, shape index: {}]   ;;  %s1324_s2 = inlined_call_operand.vmem [shape: f32[1,256], index: 2, kind: input, shape index: {}]   ;;  %s1325_s3 = inlined_call_operand.hbm [shape: f32[256,128], index: 3, kind: input, shape index: {}]   ;;  %s1326_s4 = inlined_call_operand.vmem [shape: f32[1,128], index: 4, kind: input, shape index: {}]   ;;  %s1327_s5 = inlined_call_operand.vmem [shape: f32[1,128], index: 5, kind: input, shape index: {}]   ;;  %s1328_s6 = inlined_call_operand.vmem [shape: f32[1,128], index: 6, kind: input, shape index: {}]   ;;  %s1329_s7 = inlined_call_operand.hbm [shape: f32[16,128], index: 7, kind: output, shape index: {}]  }
   0x1   :  { %1334 = sst [smem:[#allocation14_spill]] %s1323_s1 }
   0x2   :  { %1335 = sst [smem:[#allocation15_spill]] %s1325_s3 }
   0x3   :  { %12 = vsyncpa [#allocation4], 0 }
   0x4   :  { %14 = vsyncpa [#allocation4 + $0x1], 0 }
   0x5   :  { %15 = vsyncpa [#allocation7], 0 }
   0x6   :  { %16 = vsyncpa [#allocation5], 0 }
   0x7   :  { %18 = vsyncpa [#allocation5 + $0x1], 0  ;;  %s1129_s24 = smov 0   ;;  %s1131_s25 = smov 0  }
   0x8   :  { %s1133_s26 = smov 0   ;;  %s1135_s27 = smov 0  }
   0x9   :  { %s1137_s28 = smov 0   ;;  %s1139_s29 = smov 0  }
   0xa LB: > { %s768_s30 = sadd.s32 4294967295, %s1078_s29   ;;  %s769_s8 = sadd.s32 4294967294, %s1078_s29   ;;  %s1078_s29 = sphi %s1139_s29, %s24_s29   ;;  %s1074_s28 = sphi %s1137_s28, %s1356_s28   ;;  %s1070_s27 = sphi %s1135_s27, %s1355_s27   ;;  %s1066_s26 = sphi %s1133_s26, %s1354_s26   ;;  %s1062_s25 = sphi %s1131_s25, %s1353_s25   ;;  %s1058_s24 = sphi %s1129_s24, %s1352_s24  }
   0xb   : > { %p56_p0 = scmp.ne.s32.totalorder %s1062_s25, %s1058_s24  ;;  %p1163_p1 = scmp.eq.s32.totalorder %s768_s30, 0 }
   0xc   : > { %p1167_p2 = scmp.eq.s32.totalorder %s768_s30, 1  ;;  %p227_p3 = scmp.eq.s32.totalorder %s769_s8, 1 }
   0xd   : > { %s1336_s9 = scalar_select %p1163_p1, 1, 0 }
   0xe   : > { %p1173_p4 = por %p1163_p1, %p56_p0  ;;  %p770_p5 = scmp.ge.s32.totalorder %s1078_s29, 1 }
   0xf   : > { %p1178_p6 = por %p227_p3, %p56_p0  ;;  %p234_p7 = scmp.lt.s32.totalorder %s1078_s29, 3 }
  0x10   : > { %s1338_s11 = scalar_select %p1173_p4, 1, 0 }
  0x11   : > { %s1339_s12 = scalar_select %p1178_p6, 1, 0 }
  0x12   : > { %p1183_p8 = pnand %p770_p5, %p234_p7  ;;  %s1080_s14 = smov [#allocation6]  }
  0x13   : > { %s249_s15 = sshll.u32 %s1080_s14, 4  ;;  %s1081_s17 = smov [#allocation8]   ;;  %s250_s15 = int_to_ptr.vmem [resolvable:$true] %s249_s15 }
  0x14   : > { %p836_p9 = pneg %p1183_p8  ;;  %s273_s18 = sshll.u32 %s1081_s17, 4  ;;  %s274_s18 = int_to_ptr.vmem [resolvable:$true] %s273_s18 }
  0x15   : > { %s925_s19 = scalar_lea.vmem %s250_s15, 4096  ;;  %p933_p5 = scmp.lt.s32.totalorder %s250_s15, %s250_s15 }
  0x16   : > { %p1192_p11 = pnand %p836_p9, %p1163_p1  ;;  %p926_p13 = scmp.ne.s32.totalorder %s250_s15, %s925_s19 }
  0x17   : > { %p934_p7 = scmp.lt.s32.totalorder %s925_s19, %s925_s19 }
  0x18   : > { %p916_p12 = pneg %p1192_p11 }
  0x19   : > { %p935_p10 = por %p934_p7, %p933_p5 }
  0x1a   : > { %p928_p0 = pnand %p926_p13, %p916_p12 }
  0x1c   : > { %p929_p3 = pneg %p928_p0 }
  0x1e   : > { %p936_p9 = pnand %p935_p10, %p929_p3 }
  0x20   : > { %939 = shalt.err (!%p936_p9)
}
  0x21   : > { %s1082_s20 = smov 256   ;;  %s1083_s21 = smov 16  }
  0x22   : > { %s1342_s1 = sld [smem:[#allocation14_spill]]  ;;  %s951_s30 = scalar_lea.vmem %s274_s18, 4096 }
  0x23   : > { %p952_p6 = scmp.ne.s32.totalorder %s274_s18, %s951_s30  ;;  %p959_p1 = scmp.lt.s32.totalorder %s274_s18, %s274_s18 }
  0x24   : > { %p960_p4 = scmp.lt.s32.totalorder %s951_s30, %s951_s30 }
  0x25   : > { %p954_p13 = pnand %p952_p6, %p916_p12 }
  0x26   : > { %p961_p5 = por %p960_p4, %p959_p1 }
  0x27   : > { %p955_p0 = pneg %p954_p13 }
  0x28   : > { %839 = dma.hbm_to_vmem [thread:$0]  (!%p1192_p11), %s1342_s1, 4096, %s250_s15, [#allocation7], %s1082_s20, %s1082_s20, %s1083_s21  }
  0x29   : > { %p962_p10 = pnand %p961_p5, %p955_p0 }
  0x2b   : > { %965 = shalt.err (!%p962_p10)
}
  0x2c   : > { %s1084_s8 = smov 128   ;;  %s1085_s14 = smov 8  }
  0x2d   : > { %s1343_s3 = sld [smem:[#allocation15_spill]]  ;;  %s36_s19 = sadd.s32 1, %s1074_s28 }
  0x2e   : > { %s43_s20 = sadd.s32 1, %s1066_s26  ;;  %p38_p1 = scmp.ge.s32.totalorder %s36_s19, 2 }
  0x2f   : > { %p50_p4 = scmp.ne.s32.totalorder %s1066_s26, %s1062_s25  ;;  %p51_p6 = scmp.eq.s32.totalorder %s1078_s29, 0 }
  0x30   : > { %p853_p12 = scmp.lt.s32.totalorder %s1078_s29, 2  ;;  %s1358_s19 = smov (%p38_p1, %s36_s19), 0 }
  0x31   : > { %1344 = sst [smem:[#allocation13_spill]] %s1358_s19  ;;  %p52_p3 = por %p51_p6, %p50_p4 }
  0x32   : > { %p1224_p7 = por %p1167_p2, %p50_p4  ;;  %s40_s16 = ssub.s32 %s1074_s28, %s1358_s19 }
  0x33   : > { %842 = dma.hbm_to_vmem [thread:$0]  (!%p1192_p11), %s1343_s3, 4096, %s274_s18, [#allocation7], %s1084_s8, %s1084_s8, %s1085_s14  }
  0x34   : > { %s296_s22 = sand.u32 1, %s1066_s26   ;;  %p41_p9 = scmp.eq.s32.totalorder %s40_s16, 0 }
  0x35   : > { %s775_s18 = sshll.u32 %s296_s22, 3  ;;  %s776_s23 = sshll.u32 %s1074_s28, 7 }
  0x36   : > { %s1233_s30 = scalar_select %p41_p9, %s1066_s26, %s43_s20  }
  0x37   : > { %s305_s15 = scalar_lea.hbm %s1322_s0, %s776_s23  ;;  %s300_s17 = scalar_lea.vmem [#allocation3], %s775_s18 }
  0x38   : > { %s307_s1 = sshll.u32 %s300_s17, 4  ;;  %p1240_p11 = pnand %p853_p12, %p52_p3  ;;  %s308_s1 = int_to_ptr.vmem [resolvable:$true] %s307_s1 }
  0x39   : > { %s297_s3 = scalar_lea.sflag [#allocation4], %s296_s22  ;;  %s979_s16 = scalar_lea.vmem %s308_s1, 128 }
  0x3a   : > { %p968_p2 = pneg %p1240_p11  ;;  %p980_p13 = scmp.ne.s32.totalorder %s308_s1, %s979_s16 }
  0x3b   : > { %s1086_s20 = smov [#allocation3]  }
  0x3c   : > { %p982_p0 = pnand %p980_p13, %p968_p2  ;;  %s984_s19 = sshll.u32 %s1086_s20, 4  ;;  %s985_s19 = int_to_ptr.vmem [resolvable:$false] %s984_s19 }
  0x3d   : > { %s986_s23 = scalar_lea.vmem %s985_s19, 256  ;;  %p987_p10 = scmp.lt.s32.totalorder %s308_s1, %s985_s19 }
  0x3e   : > { %p983_p5 = pneg %p982_p0  ;;  %p988_p1 = scmp.lt.s32.totalorder %s986_s23, %s979_s16 }
  0x40   : > { %p989_p4 = por %p988_p1, %p987_p10 }
  0x42   : > { %p990_p6 = pnand %p989_p4, %p983_p5 }
  0x44   : > { %993 = shalt.err (!%p990_p6)
}
  0x45   : > { %846 = dma.hbm_to_vmem [thread:$0]  (!%p1240_p11), %s305_s15, 128, %s308_s1, %s297_s3  }
  0x46   : > { %316 = sbr.rel (%p1183_p8) target bundleno = 832 (0x340), region = 48  ;;  %s1251_s22 = sand.u32 (!%p1183_p8), 1, %s1062_s25  }
  0x47   : > { %s778_s18 = sshll.u32 (!%p1183_p8), %s1251_s22, 3  ;;  %s319_s8 = scalar_lea.sflag (!%p1183_p8), [#allocation4], %s1251_s22 }
  0x48   : > { %s1257_s19 = scalar_lea.vmem (!%p1183_p8), [#allocation3], %s778_s18  ;;  %p1347_p12 = scmp.ne.s32.totalorder (!%p1183_p8), %s1338_s11, 0 }
  0x4b   : > { %1045 = dma.done.wait (%p1347_p12), %s319_s8, 128  }
  0x4c   : > { %1047 = vsyncadd (%p1347_p12), %s319_s8, 4294967168  ;;  %p1348_p3 = scmp.ne.s32.totalorder %s1336_s9, 0 }
  0x4e   : > { %1049 = dma.done.wait (%p1348_p3), [#allocation7], 8192  }
  0x4f   : > { %1051 = vsyncadd (%p1348_p3), [#allocation7], 4294959104  ;;  %v1087_v0 = vmov 0.0   ;;  %v409_v1 = vld [vmem:[#allocation6 + $0xf8] sm:$0xff]  ;;  %v408_v2 = vld [vmem:[#allocation6 + $0xf0] sm:$0xff]  ;;  %s786_s10 = sshll.u32 %s1070_s27, 7 }
  0x50   : > { %486 = vmatprep.mubr.f32.mxu0 %v1087_v0  ;;  %v407_v3 = vld [vmem:[#allocation6 + $0xe8] sm:$0xff]  ;;  %422 = vmatprep.subr.mxu0 %v409_v1  ;;  %v406_v4 = vld [vmem:[#allocation6 + $0xe0] sm:$0xff]  ;;  %v405_v5 = vld [vmem:[#allocation6 + $0xd8] sm:$0xff]  ;;  %s364_s16 = scalar_lea.vmem [#allocation9], %s778_s18  ;;  %s642_s1 = scalar_lea.sflag [#allocation5], %s1251_s22 }
  0x51   : > { %423 = vmatpush1.msra.mxu0 %v408_v2  ;;  %v404_v6 = vld [vmem:[#allocation6 + $0xd0] sm:$0xff]  ;;  %v403_v7 = vld [vmem:[#allocation6 + $0xc8] sm:$0xff]  ;;  %v402_v8 = vld [vmem:[#allocation6 + $0xc0] sm:$0xff]  ;;  %v412_v2 = vlaneseq  ;;  %s655_s20 = sshll.u32 %s364_s16, 4  ;;  %s1088_s9 = smov [#allocation9]   ;;  %s656_s20 = int_to_ptr.vmem [resolvable:$true] %s655_s20 }
  0x52   : > { %424 = vmatprep.subr.mxu0 %v407_v3  ;;  %v401_v9 = vld [vmem:[#allocation6 + $0xb8] sm:$0xff]  ;;  %v400_v10 = vld [vmem:[#allocation6 + $0xb0] sm:$0xff]  ;;  %v399_v11 = vld [vmem:[#allocation6 + $0xa8] sm:$0xff]  ;;  %s994_s3 = scalar_lea.vmem %s656_s20, 128  ;;  %s998_s11 = sshll.u32 %s1088_s9, 4  ;;  %s999_s11 = int_to_ptr.vmem [resolvable:$false] %s998_s11 }
  0x53   : > { %425 = vmatpush1.msra.mxu0 %v406_v4  ;;  %v398_v12 = vld [vmem:[#allocation6 + $0xa0] sm:$0xff]  ;;  %v397_v13 = vld [vmem:[#allocation6 + $0x98] sm:$0xff]  ;;  %v396_v14 = vld [vmem:[#allocation6 + $0x90] sm:$0xff]  ;;  %v413_v3 = vshrl.u32 %v412_v2, 7  ;;  %p995_p8 = scmp.ne.s32.totalorder %s656_s20, %s994_s3  ;;  %s1000_s27 = scalar_lea.vmem %s999_s11, 256 }
  0x54   : > { %426 = vmatprep.subr.mxu0 %v405_v5  ;;  %v527_v15 = vld [vmem:[#allocation8 + $0xf8] sm:$0xff]  ;;  %v526_v17 = vld [vmem:[#allocation8 + $0xf0] sm:$0xff]  ;;  %v395_v18 = vld [vmem:[#allocation6 + $0x88] sm:$0xff]  ;;  %p1001_p2 = scmp.lt.s32.totalorder %s656_s20, %s999_s11  ;;  %p1002_p13 = scmp.lt.s32.totalorder %s1000_s27, %s994_s3 }
  0x55   : > { %427 = vmatpush1.msra.mxu0 %v404_v6  ;;  %v511_v16 = vld [vmem:[#allocation8 + $0x78] sm:$0xff]  ;;  %789 = vmatprep.subr.mxu1 %v527_v15  ;;  %v510_v19 = vld [vmem:[#allocation8 + $0x70] sm:$0xff]  ;;  %v394_v20 = vld [vmem:[#allocation6 + $0x80] sm:$0xff]  ;;  %v414_v4 = vsub.s32 0, %v413_v3  ;;  %v418_v6 = vsub.s32 1, %v413_v3  ;;  %p996_p9 = pnand %p995_p8, %p1224_p7 }
  0x56   : > { %428 = vmatprep.subr.mxu0 %v403_v7  ;;  %790 = vmatpush3.msra.mxu1 %v511_v16  ;;  %v525_v21 = vld [vmem:[#allocation8 + $0xe8] sm:$0xff]  ;;  %v393_v22 = vld [vmem:[#allocation6 + $0x78] sm:$0xff]  ;;  %v392_v24 = vld [vmem:[#allocation6 + $0x70] sm:$0xff]  ;;  %p1003_p0 = por %p1002_p13, %p1001_p2 }
  0x57   : > { %429 = vmatpush1.msra.mxu0 %v402_v8  ;;  %791 = vmatprep.subr.mxu1 %v526_v17  ;;  %v509_v23 = vld [vmem:[#allocation8 + $0x68] sm:$0xff]  ;;  %v524_v25 = vld [vmem:[#allocation8 + $0xe0] sm:$0xff]  ;;  %v523_v29 = vld [vmem:[#allocation8 + $0xd8] sm:$0xff]  ;;  %p997_p11 = pneg %p996_p9 }
  0x58   : > { %430 = vmatprep.subr.mxu0 %v401_v9  ;;  %792 = vmatpush3.msra.mxu1 %v510_v19  ;;  %v391_v26 = vld [vmem:[#allocation6 + $0x68] sm:$0xff]  ;;  %v508_v27 = vld [vmem:[#allocation8 + $0x60] sm:$0xff]  ;;  %v389_v30 = vld [vmem:[#allocation6 + $0x58] sm:$0xff] }
  0x59   : > { %431 = vmatpush1.msra.mxu0 %v400_v10  ;;  %793 = vmatprep.subr.mxu1 %v525_v21  ;;  %v390_v28 = vld [vmem:[#allocation6 + $0x60] sm:$0xff]  ;;  %v507_v31 = vld [vmem:[#allocation8 + $0x58] sm:$0xff]  ;;  %v388_v32 = vld [vmem:[#allocation6 + $0x50] sm:$0xff]  ;;  %p1004_p5 = pnand %p1003_p0, %p997_p11 }
  0x5a   : > { %432 = vmatprep.subr.mxu0 %v399_v11  ;;  %794 = vmatpush3.msra.mxu1 %v509_v23  ;;  %v522_v33 = vld [vmem:[#allocation8 + $0xd0] sm:$0xff]  ;;  %v387_v34 = vld [vmem:[#allocation6 + $0x48] sm:$0xff]  ;;  %v386_v36 = vld [vmem:[#allocation6 + $0x40] sm:$0xff] }
  0x5b   : > { %433 = vmatpush1.msra.mxu0 %v398_v12  ;;  %795 = vmatprep.subr.mxu1 %v524_v25  ;;  %v506_v35 = vld [vmem:[#allocation8 + $0x50] sm:$0xff]  ;;  %v521_v37 = vld [vmem:[#allocation8 + $0xc8] sm:$0xff]  ;;  %v385_v38 = vld [vmem:[#allocation6 + $0x38] sm:$0xff] }
  0x5c   : > { %434 = vmatprep.subr.mxu0 %v397_v13  ;;  %796 = vmatpush3.msra.mxu1 %v508_v27  ;;  %v505_v39 = vld [vmem:[#allocation8 + $0x48] sm:$0xff]  ;;  %v384_v40 = vld [vmem:[#allocation6 + $0x30] sm:$0xff]  ;;  %v520_v41 = vld [vmem:[#allocation8 + $0xc0] sm:$0xff] }
  0x5d   : > { %435 = vmatpush1.msra.mxu0 %v396_v14  ;;  %797 = vmatprep.subr.mxu1 %v523_v29  ;;  %v383_v42 = vld [vmem:[#allocation6 + $0x28] sm:$0xff]  ;;  %v504_v43 = vld [vmem:[#allocation8 + $0x40] sm:$0xff]  ;;  %v519_v45 = vld [vmem:[#allocation8 + $0xb8] sm:$0xff] }
  0x5e   : > { %436 = vmatprep.subr.mxu0 %v395_v18  ;;  %798 = vmatpush3.msra.mxu1 %v507_v31  ;;  %v382_v44 = vld [vmem:[#allocation6 + $0x20] sm:$0xff]  ;;  %v381_v46 = vld [vmem:[#allocation6 + $0x18] sm:$0xff]  ;;  %v380_v48 = vld [vmem:[#allocation6 + $0x10] sm:$0xff] }
  0x5f   : > { %437 = vmatpush1.msra.mxu0 %v394_v20  ;;  %799 = vmatprep.subr.mxu1 %v522_v33  ;;  %v503_v47 = vld [vmem:[#allocation8 + $0x38] sm:$0xff]  ;;  %v518_v49 = vld [vmem:[#allocation8 + $0xb0] sm:$0xff]  ;;  %v379_v50 = vld [vmem:[#allocation6 + $0x8] sm:$0xff] }
  0x60   : > { %438 = vmatprep.subr.mxu0 %v393_v22  ;;  %800 = vmatpush3.msra.mxu1 %v506_v35  ;;  %v502_v51 = vld [vmem:[#allocation8 + $0x30] sm:$0xff]  ;;  %v378_v52 = vld [vmem:[#allocation6] sm:$0xff]  ;;  %v517_v53 = vld [vmem:[#allocation8 + $0xa8] sm:$0xff] }
  0x61   : > { %439 = vmatpush1.msra.mxu0 %v392_v24  ;;  %801 = vmatprep.subr.mxu1 %v521_v37  ;;  %v377_v54 = vld [vmem:[%s1257_s19] sm:$0xff]  ;;  %v501_v55 = vld [vmem:[#allocation8 + $0x28] sm:$0xff]  ;;  %v516_v56 = vld [vmem:[#allocation8 + $0xa0] sm:$0xff]  ;;  %s653_s19 = scalar_lea.hbm %s1329_s7, %s786_s10 }
  0x62   : > { %440 = vmatprep.subr.mxu0 %v391_v26  ;;  %802 = vmatpush3.msra.mxu1 %v505_v39  ;;  %v500_v57 = vld [vmem:[#allocation8 + $0x20] sm:$0xff]  ;;  %v515_v58 = vld [vmem:[#allocation8 + $0x98] sm:$0xff]  ;;  %v514_v60 = vld [vmem:[#allocation8 + $0x90] sm:$0xff] }
  0x63   : > { %441 = vmatpush1.msra.mxu0 %v390_v28  ;;  %803 = vmatprep.subr.mxu1 %v520_v41  ;;  %v499_v59 = vld [vmem:[#allocation8 + $0x18] sm:$0xff]  ;;  %v498_v61 = vld [vmem:[#allocation8 + $0x10] sm:$0xff]  ;;  %v513_v62 = vld [vmem:[#allocation8 + $0x88] sm:$0xff] }
  0x64   : > { %442 = vmatprep.subr.mxu0 %v389_v30  ;;  %804 = vmatpush3.msra.mxu1 %v504_v43  ;;  %v497_v63 = vld [vmem:[#allocation8 + $0x8] sm:$0xff]  ;;  %v512_v0 = vld [vmem:[#allocation8 + $0x80] sm:$0xff]  ;;  %v410_v5 = vld [vmem:[%s1324_s2] sm:$0x3] }
  0x65   : > { %443 = vmatpush1.msra.mxu0 %v388_v32  ;;  %805 = vmatprep.subr.mxu1 %v519_v45  ;;  %v496_v1 = vld [vmem:[#allocation8] sm:$0xff]  ;;  %v415_v7 = vrot.slane %v410_v5, %v414_v4  ;;  %v419_v8 = vrot.slane %v410_v5, %v418_v6  ;;  %v782_v17 = vld [vmem:[%s1326_s4] ss:$0 sm:$0xff] }
  0x66   : > { %444 = vmatprep.subr.mxu0 %v387_v34  ;;  %806 = vmatpush3.msra.mxu1 %v503_v47  ;;  %v783_v29 = vld [vmem:[%s1327_s5] ss:$0 sm:$0xff] }
  0x67   : > { %445 = vmatpush1.msra.mxu0 %v386_v36  ;;  %807 = vmatprep.subr.mxu1 %v518_v49  ;;  %v784_v31 = vld [vmem:[%s1328_s6] ss:$0 sm:$0xff] }
  0x68   : > { %446 = vmatprep.subr.mxu0 %v385_v38  ;;  %808 = vmatpush3.msra.mxu1 %v502_v51 }
  0x69   : > { %447 = vmatpush1.msra.mxu0 %v384_v40  ;;  %809 = vmatprep.subr.mxu1 %v517_v53 }
  0x6a   : > { %448 = vmatprep.subr.mxu0 %v383_v42  ;;  %810 = vmatpush3.msra.mxu1 %v501_v55 }
  0x6b   : > { %449 = vmatpush1.msra.mxu0 %v382_v44  ;;  %811 = vmatprep.subr.mxu1 %v516_v56 }
  0x6c   : > { %450 = vmatprep.subr.mxu0 %v381_v46  ;;  %812 = vmatpush3.msra.mxu1 %v500_v57 }
  0x6d   : > { %451 = vmatpush1.msra.mxu0 %v380_v48  ;;  %813 = vmatprep.subr.mxu1 %v515_v58 }
  0x6e   : > { %452 = vmatprep.subr.mxu0 %v379_v50  ;;  %814 = vmatpush3.msra.mxu1 %v499_v59 }
  0x6f   : > { %453 = vmatpush1.msra.mxu0 %v378_v52  ;;  %815 = vmatprep.subr.mxu1 %v514_v60 }
  0x70   : > { %487 = vmatmul.mubr.f32.vlgmr.msra.gmra.mxu0 %v377_v54  ;;  %816 = vmatpush3.msra.mxu1 %v498_v61 }
  0x71   : > { %817 = vmatprep.subr.mxu1 %v513_v62 }
  0x72   : > { %818 = vmatpush3.msra.mxu1 %v497_v63 }
  0x73   : > { %819 = vmatprep.subr.mxu1 %v512_v0 }
  0x74   : > { %820 = vmatpush3.msra.mxu1 %v496_v1 }
 0x130   : > { %v488_v9 = vpop.f32.mrf.mxu0 }
 0x131   : > { %v489_v10 = vadd.f32 %v488_v9, %v415_v7 }
 0x132   : > { %v490_v11 = vpop.f32.mrf.mxu0 }
 0x133   : > { %v491_v12 = vadd.f32 %v490_v11, %v419_v8  ;;  %v493_v14 = vmax.f32 %v489_v10, 0.0 }
 0x135   : > { %v494_v13 = vmax.f32 %v491_v12, 0.0 }
 0x137   : > { %592 = vmatprep.mubr.f32.mxu1 %v494_v13 }
 0x138   : > { %593 = vmatmul.mubr.f32.vlgmr.msra.gmra.mxu1 %v493_v14 }
 0x1f8   : > { %v821_v15 = vpop.f32.mrf.mxu1 }
 0x1fa   : > { %v822_v16 = vpop.f32.mrf.mxu1 }
 0x1fb   : > { %v823_v18 = vadd.f32 %v822_v16, %v821_v15 }
 0x1fd   : > { %v611_v19 = vadd.f32 %v823_v18, %v782_v17 }
 0x1ff   : > { %v612_v20 = vadd.f32 %v611_v19, %v377_v54 }
 0x201   : > { %613 = vadd.xlane.f32.xlu0 %v612_v20 }
 0x28a   : > { %v614_v21 = vpop.xlane.xlu0 %613 }
 0x28b   : > { %v615_v22 = vmul.f32 0.0078125, %v614_v21 }
 0x28d   : > { %v616_v23 = vsub.f32 %v612_v20, %v615_v22 }
 0x28f   : > { %v617_v24 = vmul.f32 %v616_v23, %v616_v23 }
 0x291   : > { %618 = vadd.xlane.f32.xlu0 %v617_v24 }
 0x31a   : > { %v619_v25 = vpop.xlane.xlu0 %618 }
 0x31b   : > { %v620_v26 = vmul.f32 0.0078125, %v619_v25 }
 0x31d   : > { %v621_v27 = vadd.f32 1e-05, %v620_v26 }
 0x31f   : > { %912 = vrsqrt.f32 %v621_v27 }
 0x32c   : > { %v913_v28 = vpop.eup %912 }
 0x32d   : > { %v623_v30 = vmul.f32 %v913_v28, %v616_v23 }
 0x32f   : > { %v631_v32 = vmul.f32 %v783_v29, %v623_v30 }
 0x331   : > { %v639_v33 = vadd.f32 %v784_v31, %v631_v32 }
 0x333   : > { %640 = vst [vmem:[%s364_s16] sm:$0xff] %v639_v33 }
 0x334   : > { %1007 = shalt.err (!%p1004_p5)
}
 0x335   : > { %s1008_s18 = scalar_lea.hbm %s653_s19, 128  ;;  %s1012_s14 = scalar_lea.hbm %s1329_s7, 256 }
 0x336   : > { %p1009_p10 = scmp.ne.s32.totalorder %s653_s19, %s1008_s18  ;;  %p1013_p6 = scmp.lt.s32.totalorder %s653_s19, %s1329_s7 }
 0x337   : > { %p1014_p12 = scmp.lt.s32.totalorder %s1012_s14, %s1008_s18 }
 0x338   : > { %p1010_p1 = pnand %p1009_p10, %p1224_p7 }
 0x339   : > { %p1015_p3 = por %p1014_p12, %p1013_p6 }
 0x33a   : > { %p1011_p4 = pneg %p1010_p1 }
 0x33c   : > { %p1016_p8 = pnand %p1015_p3, %p1011_p4 }
 0x33e   : > { %1019 = shalt.err (!%p1016_p8)
}
 0x33f   : > { %834 = dma.vmem_to_hbm [thread:$0]  (%p1224_p7), %s656_s20, 128, %s653_s19, %s642_s1  }
 0x340 PF: > { %s667_s10 = sand.u32 1, %s1058_s24   ;;  %p1349_p9 = scmp.ne.s32.totalorder %s1339_s12, 0 }
 0x341   : > { %p1350_p11 = scmp.ge.s32.totalorder %s1078_s29, 2  ;;  %s668_s16 = scalar_lea.sflag [#allocation5], %s667_s10 }
 0x343   : > { %p848_p2 = pnand %p1350_p11, %p1349_p9 }
 0x345   : > { %p849_p13 = pneg %p848_p2 }
 0x347   : > { %1053 = dma.done.wait (%p849_p13), %s668_s16, 128  }
 0x348   : > { %1055 = vsyncadd (%p849_p13), %s668_s16, 4294967168  ;;  %s24_s29 = sadd.s32 1, %s1078_s29   ;;  %s1351_s21 = sld [smem:[#allocation13_spill]] }
 0x349   : > { %p21_p0 = scmp.ge.s32.totalorder %s24_s29, 4   ;;  %s1352_s24 = smov %s1062_s25 }
 0x34a   : > { %s1353_s25 = smov %s1066_s26  ;;  %s1354_s26 = smov %s1233_s30 }
 0x34b   : > { %s1355_s27 = smov %s1074_s28  ;;  %23 = sbr.rel (!%p21_p0) target bundleno = 10 (0xa), region = 114 }
 0x34e   : > { %s1356_s28 = smov %s1351_s21 }
 0x350   :  { %673 = vsyncpa [#allocation4], 1 }
 0x351   :  { %675 = vsyncpa [#allocation4 + $0x1], 1 }
 0x352   :  { %676 = vsyncpa [#allocation7], 1 }
 0x353   :  { %677 = vsyncpa [#allocation5], 1 }
 0x354   :  { %679 = vsyncpa [#allocation5 + $0x1], 1 }

</bundles_post_ra>
